<compile_context>
chip_gen: v5e
topology: v5e:2x2
jax: 0.10.0
libtpu: 0.0.40
codegen_flags: <defaults>
</compile_context>

<pallas_src>
import jax
import jax.numpy as jnp
from jax.experimental import pallas as pl
from jax.experimental.pallas import tpu as pltpu

LANES = 128


def _tanh_kernel(x_ref, o_ref):
    x = x_ref[...].astype(jnp.float32)          # f32 intermediates, EUP tanh
    o_ref[...] = jnp.tanh(x).astype(o_ref.dtype)


def _default_tile_rows():
    """Bigger blocks on v6e/v7x (plenty of scoped VMEM); conservative elsewhere."""
    try:
        kind = jax.devices()[0].device_kind.lower()
    except Exception:  # pragma: no cover - defensive
        kind = ""
    if "v6" in kind or "v7" in kind:
        return 8192   # 4 MiB f32 block; in+out double-buffered = 16 MiB
    return 4096       # 2 MiB f32 block; fits v5e's 16 MiB default scoped VMEM


def tanh(x, *, tile_rows=None, min_pallas_elems=65536):
    """Elementwise tanh via Pallas. Matches torch.nn.Tanh forward.

    x: any shape / float dtype. Returns same shape / dtype.
    tile_rows: rows per block of the (rows, 128) lane-dense view.
    min_pallas_elems: below this size, fall back to plain jnp.tanh (launch
        overhead dominates; XLA can fuse it with neighbours).
    """
    orig_shape = x.shape
    orig_dtype = x.dtype
    n = x.size

    # Small-input (or empty) fast path.
    if n == 0 or n < min_pallas_elems:
        return jnp.tanh(x.astype(jnp.float32)).astype(orig_dtype)

    x_flat = jnp.reshape(x, (-1,))

    # Ragged sizes: pad the tail up to a full lane-row once (single extra pass),
    # slice it off at the end.
    rem = n % LANES
    if rem:
        # TODO(synk): handle the final partial lane-row in-kernel with a masked
        # store (scalar-prefetched length) to remove the pad/slice passes.
        x_flat = jnp.pad(x_flat, (0, LANES - rem))
    n_pad = x_flat.size
    rows = n_pad // LANES
    x2d = jnp.reshape(x_flat, (rows, LANES))

    # Tile rows: multiple of 16 (bf16/fp16 min-tile safe), capped to rows.
    tr = tile_rows if tile_rows is not None else _default_tile_rows()
    tr = max(16, (int(tr) // 16) * 16)
    tr = min(tr, rows)
    grid = (pl.cdiv(rows, tr),)   # partial last block masked by Pallas

    dtype_bytes = jnp.dtype(orig_dtype).itemsize
    cost = pl.CostEstimate(
        flops=0,
        transcendentals=n_pad,
        bytes_accessed=2 * n_pad * dtype_bytes,
    )

    out2d = pl.pallas_call(
        _tanh_kernel,
        out_shape=jax.ShapeDtypeStruct((rows, LANES), orig_dtype),
        grid_spec=pltpu.PrefetchScalarGridSpec(
            num_scalar_prefetch=0,
            grid=grid,
            in_specs=[pl.BlockSpec((tr, LANES), lambda i: (i, 0))],
            out_specs=pl.BlockSpec((tr, LANES), lambda i: (i, 0)),
        ),
        cost_estimate=cost,
        compiler_params=pltpu.CompilerParams(
            # Single independent axis; shards across TensorCores on v7x.
            dimension_semantics=("parallel",),
        ),
    )(x2d)

    out_flat = jnp.reshape(out2d, (-1,))
    if rem:
        out_flat = out_flat[:n]
    return jnp.reshape(out_flat, orig_shape)


if __name__ == "__main__":
    key = jax.random.PRNGKey(0)
    k0, k1, k2 = jax.random.split(key, 3)

    # Primary small NCHW shape consistent with a conv-net activation.
    # Force the Pallas path so the kernel itself is exercised.
    x_small = jax.random.normal(k0, (2, 4, 16, 16), dtype=jnp.float32)
    y_small = jax.block_until_ready(tanh(x_small, min_pallas_elems=0))
    assert y_small.shape == x_small.shape and y_small.dtype == x_small.dtype
    assert jnp.allclose(y_small, jnp.tanh(x_small), atol=1e-5, rtol=1e-5)

    # Default path: larger lane-aligned size (n % 128 == 0) -> single pallas_call.
    x_big = jax.random.normal(k1, (4, 8, 64, 128), dtype=jnp.float32)
    y_big = jax.block_until_ready(tanh(x_big))
    assert jnp.allclose(y_big, jnp.tanh(x_big), atol=1e-5, rtol=1e-5)

    # Ragged size (n % 128 != 0) -> pad-then-slice path through the kernel.
    x_rag = jax.random.normal(k2, (3, 5, 77, 65), dtype=jnp.float32)
    y_rag = jax.block_until_ready(tanh(x_rag, min_pallas_elems=0))
    assert jnp.allclose(y_rag, jnp.tanh(x_rag), atol=1e-5, rtol=1e-5)

    # bf16 round-trip check (f32 compute inside kernel, cast at store).
    x_bf = x_small.astype(jnp.bfloat16)
    y_bf = jax.block_until_ready(tanh(x_bf, min_pallas_elems=0))
    assert y_bf.dtype == jnp.bfloat16
    assert jnp.allclose(y_bf.astype(jnp.float32),
                        jnp.tanh(x_bf.astype(jnp.float32)), atol=1e-2, rtol=1e-2)

    print("KERNEL_OK")
</pallas_src>

<mosaic_0001>
module attributes {stable_mosaic.version = 11 : i64} {
  func.func @_tanh_kernel(%arg0: i32, %arg1: memref<16x128xf32, #tpu.memory_space<vmem>>, %arg2: memref<16x128xf32, #tpu.memory_space<vmem>>) attributes {dimension_semantics = [#tpu.dimension_semantics<parallel>], iteration_bounds = array<i64: 1>, scalar_prefetch = 0 : i64, scratch_operands = 0 : i64, tpu.core_type = #tpu.core_type<tc>, window_params = [{transform_indices = @transform_0, window_bounds = array<i64: 16, 128>}, {transform_indices = @transform_1, window_bounds = array<i64: 16, 128>}]} {
    %c0 = arith.constant 0 : index
    %c0_0 = arith.constant 0 : index
    %0 = vector.load %arg1[%c0, %c0_0] : memref<16x128xf32, #tpu.memory_space<vmem>>, vector<16x128xf32>
    %1 = math.tanh %0 : vector<16x128xf32>
    %c0_1 = arith.constant 0 : index
    %c0_2 = arith.constant 0 : index
    %2 = vector.load %arg2[%c0_1, %c0_2] : memref<16x128xf32, #tpu.memory_space<vmem>>, vector<16x128xf32>
    tpu.vector_store %arg2[%c0_1, %c0_2], %1 {strides = array<i32>} : memref<16x128xf32, #tpu.memory_space<vmem>>, vector<16x128xf32>,
    return
  }
  func.func @transform_0(%arg0: i32) -> (i32, i32) {
    %c0_i32 = arith.constant 0 : i32
    %c0_i32_0 = arith.constant 0 : i32
    return %arg0, %c0_i32 : i32, i32
  }
  func.func @transform_1(%arg0: i32) -> (i32, i32) {
    %c0_i32 = arith.constant 0 : i32
    %c0_i32_0 = arith.constant 0 : i32
    return %arg0, %c0_i32 : i32, i32
  }
}

</mosaic_0001>

<bundles_post_ra>
// kernel: tpu_custom_call.1
= control target key start
LH: loop header
LB: loop body
LE: loop exit
PB: predicated region body
PF: predicated region fallthrough
CT: control target
= control target key end

     0   :  { %6 = vsyncpa [#allocation3], 0  ;;  %s130_s0 = inlined_call_operand.hbm [shape: f32[16,128], index: 0, kind: input, shape index: {}]   ;;  %s131_s1 = inlined_call_operand.hbm [shape: f32[16,128], index: 1, kind: output, shape index: {}]  }
   0x1   :  { %7 = vsyncpa [#allocation4], 0  ;;  %s12_s8 = sshll.u32 %s130_s0, 4  ;;  %s110_s9 = smov [#allocation2]   ;;  %s13_s8 = int_to_ptr.hbm [resolvable:$true] %s12_s8 }
   0x2   :  { %s14_s10 = sshll.u32 %s110_s9, 4  ;;  %s111_s11 = smov 128   ;;  %s15_s10 = int_to_ptr.vmem [resolvable:$true] %s14_s10 }
   0x3   :  { %s112_s12 = smov 8  }
   0x4   :  { %20 = dma.hbm_to_vmem [thread:$0]  %s13_s8, 256, %s15_s10, [#allocation3], %s111_s11, %s111_s11, %s112_s12  }
   0x5   :  { %106 = dma.done.wait [#allocation3], 256  }
   0x6   :  { %107 = vsyncadd [#allocation3], 4294967040  ;;  %v25_v0 = vld [vmem:[#allocation2] sm:$0xff]  ;;  %v26_v1 = vld [vmem:[#allocation2 + $0x8] sm:$0xff]  ;;  %s113_s13 = smov [#allocation5]   ;;  %s37_s17 = sshll.u32 %s131_s1, 4  ;;  %s38_s17 = int_to_ptr.hbm [resolvable:$true] %s37_s17 }
   0x7   :  { %54 = vtanh.f32 %v25_v0  ;;  %s35_s14 = sshll.u32 %s113_s13, 4  ;;  %s36_s14 = int_to_ptr.vmem [resolvable:$true] %s35_s14 }
   0x8   :  { %56 = vtanh.f32 %v26_v1 }
   0xd   :  { %v55_v2 = vpop.eup %54 }
   0xe   :  { %v57_v3 = vpop.eup %56  ;;  %29 = vst [vmem:[#allocation5] sm:$0xff] %v55_v2 }
   0xf   :  { %30 = vst [vmem:[#allocation5 + $0x8] sm:$0xff] %v57_v3 }
  0x10   :  { %43 = dma.vmem_to_hbm [thread:$0]  %s36_s14, 256, %s38_s17, [#allocation4], %s111_s11, %s111_s11, %s112_s12  }
  0x11   :  { %108 = dma.done.wait [#allocation4], 256  }
  0x12   :  { %109 = vsyncadd [#allocation4], 4294967040 }
  0x13   :  { %48 = vsyncpa [#allocation3], 1 }
  0x14   :  { %49 = vsyncpa [#allocation4], 1 }

</bundles_post_ra>
